<compile_context>
chip_gen: v7x
topology: tpu7x:2x2x1
jax: 0.10.0
libtpu: 0.0.40
codegen_flags: <defaults>
</compile_context>

<pallas_src>
import functools

import jax
import jax.numpy as jnp
from jax.experimental import pallas as pl
from jax.experimental.pallas import tpu as pltpu

LANE = 128   # lane width (last dim) for the hidden feature dims
SUB = 8      # f32 sublane multiple for the (f32) streamed batch tiles


def _round_up(x, m):
    return ((x + m - 1) // m) * m


def _cdiv(a, b):
    return (a + b - 1) // b


def mlp_kernel(x_ref, w1_ref, b1_ref, w2_ref, b2_ref, w3_ref, b3_ref, o_ref):
    # x arrives as f32 with its logical (narrow) feature dim; cast to bf16 in
    # VMEM for the MXU.  All accumulation is f32.
    x = x_ref[...].astype(w1_ref.dtype)
    # Layer 1: Linear (bf16 MXU, f32 accumulate) + bias + ReLU (f32 VPU).
    h = jnp.dot(x, w1_ref[...], preferred_element_type=jnp.float32)
    h = jnp.maximum(h + b1_ref[...], 0.0)
    # Layer 2: Linear + bias + ReLU.
    h = jnp.dot(h.astype(w2_ref.dtype), w2_ref[...],
                preferred_element_type=jnp.float32)
    h = jnp.maximum(h + b2_ref[...], 0.0)
    # Layer 3: Linear (no activation).  Output feature dim is the logical one.
    out = jnp.dot(h.astype(w3_ref.dtype), w3_ref[...],
                  preferred_element_type=jnp.float32)
    o_ref[...] = (out + b3_ref[...]).astype(o_ref.dtype)


def prepare_params(params, compute_dtype=jnp.bfloat16):
    """Pad hidden dims to 128 lanes and cast weights to bf16 ONCE (outside the
    per-call forward path).  Input dim and output dim keep their logical sizes.
    params: [(W_io, b), ...] with W laid out (in_features, out_features)."""
    (w1, b1), (w2, b2), (w3, b3) = params
    h1, h2 = w1.shape[1], w2.shape[1]
    h1_p, h2_p = _round_up(h1, LANE), _round_up(h2, LANE)

    w1p = jnp.pad(w1, ((0, 0), (0, h1_p - h1))).astype(compute_dtype)
    w2p = jnp.pad(w2, ((0, h1_p - h1), (0, h2_p - h2))).astype(compute_dtype)
    w3p = jnp.pad(w3, ((0, h2_p - h2), (0, 0))).astype(compute_dtype)
    b1p = jnp.pad(b1, ((0, 0), (0, h1_p - h1))).astype(jnp.float32)
    b2p = jnp.pad(b2, ((0, 0), (0, h2_p - h2))).astype(jnp.float32)
    b3p = b3.astype(jnp.float32)
    return (w1p, b1p, w2p, b2p, w3p, b3p)


@functools.partial(jax.jit, static_argnames=("tile_batch",))
def mlp_forward(x, prepared, *, tile_batch=4096):
    """x: (batch, input_dim) f32; prepared: output of prepare_params()."""
    w1p, b1p, w2p, b2p, w3p, b3p = prepared
    batch, in_dim = x.shape
    h1_p = w1p.shape[1]
    h2_p = w2p.shape[1]
    out_dim = w3p.shape[1]

    # Large batch tiles (HBM-efficiency), but keep >= 2 grid steps when the
    # batch allows it so both v7x TensorCores get work.
    n_tiles = max(2, _cdiv(batch, tile_batch))
    tb = _round_up(_cdiv(batch, n_tiles), SUB)
    batch_p = _round_up(batch, tb)
    grid = (batch_p // tb,)

    # Row-only padding of f32 x (no lane-pad, no dtype copy); elided when
    # batch is already tile-aligned.
    xp = jnp.pad(x, ((0, batch_p - batch), (0, 0)))

    def resident(shape):
        # Whole-array block, same block every grid step -> DMA'd once.
        return pl.BlockSpec(shape, lambda i: (0, 0))

    flops = 2 * batch_p * (in_dim * h1_p + h1_p * h2_p + h2_p * out_dim)
    bytes_accessed = (
        xp.size * 4                                           # streamed input (f32)
        + (w1p.size + w2p.size + w3p.size) * 2                # resident bf16 weights
        + (b1p.size + b2p.size + b3p.size) * 4                # resident f32 biases
        + batch_p * out_dim * 4)                              # output writeback

    out = pl.pallas_call(
        mlp_kernel,
        out_shape=jax.ShapeDtypeStruct((batch_p, out_dim), jnp.float32),
        grid=grid,
        in_specs=[
            # x: streamed per tile, logical (narrow) last dim == full array dim.
            pl.BlockSpec((tb, in_dim), lambda i: (i, 0)),
            resident(w1p.shape), resident(b1p.shape),   # layer 1 W, b
            resident(w2p.shape), resident(b2p.shape),   # layer 2 W, b
            resident(w3p.shape), resident(b3p.shape),   # layer 3 W, b
        ],
        # Output keeps the logical out_dim as the full last dim: only useful
        # bytes are written to HBM and no post-kernel column slice is needed.
        out_specs=pl.BlockSpec((tb, out_dim), lambda i: (i, 0)),
        compiler_params=pltpu.CompilerParams(
            dimension_semantics=("parallel",),
            vmem_limit_bytes=32 * 1024 * 1024),
        cost_estimate=pl.CostEstimate(
            flops=flops, transcendentals=0, bytes_accessed=bytes_accessed),
    )(xp, w1p, b1p, w2p, b2p, w3p, b3p)

    if batch_p != batch:
        out = out[:batch]
    return out


def xavier_normal(key, out_features, in_features):
    # Matches torch.nn.init.xavier_normal_ on a (out, in) weight.
    std = (2.0 / (in_features + out_features)) ** 0.5
    return jax.random.normal(key, (out_features, in_features), jnp.float32) * std


def init_params(key, dims):
    """dims = [input_dim, *hid_dims, out_dim]; returns [(W_io, b), ...]."""
    params = []
    for i in range(len(dims) - 1):
        key, kw, kb = jax.random.split(key, 3)
        in_f, out_f = dims[i], dims[i + 1]
        w_oi = xavier_normal(kw, out_f, in_f)   # PyTorch layout (out, in)
        w_io = jnp.transpose(w_oi)              # kernel layout (in, out)
        # Deterministic bias init (PyTorch default bounds; synthetic RNG).
        bound = 1.0 / (in_f ** 0.5)
        b = jax.random.uniform(kb, (1, out_f), jnp.float32, -bound, bound)
        params.append((w_io, b))
    return params


def mlp_reference(x, params):
    """Plain-JAX reference mirroring the kernel's bf16-matmul / f32-accum path."""
    h = x
    n = len(params)
    for i, (w, b) in enumerate(params):
        h = jnp.dot(h.astype(jnp.bfloat16), w.astype(jnp.bfloat16),
                    preferred_element_type=jnp.float32) + b
        if i + 1 < n:
            h = jnp.maximum(h, 0.0)
    return h


if __name__ == "__main__":
    # Small shapes consistent with the demo's MLP(input_dim, hid_dims, out_dim).
    input_dim = 16
    hid_dims = [32, 32]
    out_dim = 8
    dims = [input_dim] + hid_dims + [out_dim]

    key = jax.random.PRNGKey(0)
    key, kx, kx2 = jax.random.split(key, 3)
    params = init_params(key, dims)
    prepared = prepare_params(params)          # pad/cast weights ONCE

    # 1) Tiny batch (single grid step after sublane padding).
    batch = 2
    x = jax.random.normal(kx, (batch, input_dim), jnp.float32)
    y = jax.block_until_ready(mlp_forward(x, prepared))
    y_ref = mlp_reference(x, params)
    assert y.shape == (batch, out_dim)
    assert jnp.allclose(y, y_ref, atol=1e-2, rtol=1e-2)

    # 2) Larger batch exercising the multi-step grid + row-padding tail path.
    batch2 = 600
    x2 = jax.random.normal(kx2, (batch2, input_dim), jnp.float32)
    y2 = jax.block_until_ready(mlp_forward(x2, prepared, tile_batch=256))
    y2_ref = mlp_reference(x2, params)
    assert y2.shape == (batch2, out_dim)
    assert jnp.allclose(y2, y2_ref, atol=1e-2, rtol=1e-2)

    print("KERNEL_OK")
</pallas_src>

<mosaic_0001>
module attributes {stable_mosaic.version = 11 : i64} {
  func.func @mlp_kernel(%arg0: i32, %arg1: memref<8x16xf32, #tpu.memory_space<vmem>>, %arg2: memref<16x128xbf16, #tpu.memory_space<vmem>>, %arg3: memref<1x128xf32, #tpu.memory_space<vmem>>, %arg4: memref<128x128xbf16, #tpu.memory_space<vmem>>, %arg5: memref<1x128xf32, #tpu.memory_space<vmem>>, %arg6: memref<128x8xbf16, #tpu.memory_space<vmem>>, %arg7: memref<1x8xf32, #tpu.memory_space<vmem>>, %arg8: memref<8x8xf32, #tpu.memory_space<vmem>>) attributes {dimension_semantics = [#tpu.dimension_semantics<parallel>], iteration_bounds = array<i64: 1>, scalar_prefetch = 0 : i64, scratch_operands = 0 : i64, tpu.core_type = #tpu.core_type<tc>, window_params = [{transform_indices = @transform_0, window_bounds = array<i64: 8, 16>}, {pipeline_mode = #tpu.pipeline_mode<synchronous>, transform_indices = @transform_1, window_bounds = array<i64: 16, 128>}, {pipeline_mode = #tpu.pipeline_mode<synchronous>, transform_indices = @transform_2, window_bounds = array<i64: 1, 128>}, {pipeline_mode = #tpu.pipeline_mode<synchronous>, transform_indices = @transform_3, window_bounds = array<i64: 128, 128>}, {pipeline_mode = #tpu.pipeline_mode<synchronous>, transform_indices = @transform_4, window_bounds = array<i64: 1, 128>}, {pipeline_mode = #tpu.pipeline_mode<synchronous>, transform_indices = @transform_5, window_bounds = array<i64: 128, 8>}, {pipeline_mode = #tpu.pipeline_mode<synchronous>, transform_indices = @transform_6, window_bounds = array<i64: 1, 8>}, {transform_indices = @transform_7, window_bounds = array<i64: 8, 8>}]} {
    %c0 = arith.constant 0 : index
    %c0_0 = arith.constant 0 : index
    %0 = vector.load %arg1[%c0, %c0_0] : memref<8x16xf32, #tpu.memory_space<vmem>>, vector<8x16xf32>
    %1 = arith.truncf %0 : vector<8x16xf32> to vector<8x16xbf16>
    %c0_1 = arith.constant 0 : index
    %c0_2 = arith.constant 0 : index
    %2 = vector.load %arg2[%c0_1, %c0_2] : memref<16x128xbf16, #tpu.memory_space<vmem>>, vector<16x128xbf16>
    %cst = arith.constant dense<0.000000e+00> : vector<8x128xf32>
    %3 = tpu.matmul %1, %2, %cst {dimension_numbers = #tpu.dot_dimension_numbers<[1], [0], [0], [1], [0, 0, 1, 1], [], []>} : vector<8x16xbf16>, vector<16x128xbf16>, vector<8x128xf32> -> vector<8x128xf32>
    %c0_3 = arith.constant 0 : index
    %c0_4 = arith.constant 0 : index
    %4 = vector.load %arg3[%c0_3, %c0_4] : memref<1x128xf32, #tpu.memory_space<vmem>>, vector<1x128xf32>
    %5 = vector.broadcast %4 : vector<1x128xf32> to vector<8x128xf32>
    %6 = arith.addf %3, %5 : vector<8x128xf32>
    %cst_5 = arith.constant 0.000000e+00 : f32
    %7 = vector.broadcast %cst_5 : f32 to vector<8x128xf32>
    %8 = arith.maximumf %6, %7 : vector<8x128xf32>
    %9 = arith.truncf %8 : vector<8x128xf32> to vector<8x128xbf16>
    %c0_6 = arith.constant 0 : index
    %c0_7 = arith.constant 0 : index
    %10 = vector.load %arg4[%c0_6, %c0_7] : memref<128x128xbf16, #tpu.memory_space<vmem>>, vector<128x128xbf16>
    %cst_8 = arith.constant dense<0.000000e+00> : vector<8x128xf32>
    %11 = tpu.matmul %9, %10, %cst_8 {dimension_numbers = #tpu.dot_dimension_numbers<[1], [0], [0], [1], [0, 0, 1, 1], [], []>} : vector<8x128xbf16>, vector<128x128xbf16>, vector<8x128xf32> -> vector<8x128xf32>
    %c0_9 = arith.constant 0 : index
    %c0_10 = arith.constant 0 : index
    %12 = vector.load %arg5[%c0_9, %c0_10] : memref<1x128xf32, #tpu.memory_space<vmem>>, vector<1x128xf32>
    %13 = vector.broadcast %12 : vector<1x128xf32> to vector<8x128xf32>
    %14 = arith.addf %11, %13 : vector<8x128xf32>
    %cst_11 = arith.constant 0.000000e+00 : f32
    %15 = vector.broadcast %cst_11 : f32 to vector<8x128xf32>
    %16 = arith.maximumf %14, %15 : vector<8x128xf32>
    %17 = arith.truncf %16 : vector<8x128xf32> to vector<8x128xbf16>
    %c0_12 = arith.constant 0 : index
    %c0_13 = arith.constant 0 : index
    %18 = vector.load %arg6[%c0_12, %c0_13] : memref<128x8xbf16, #tpu.memory_space<vmem>>, vector<128x8xbf16>
    %cst_14 = arith.constant dense<0.000000e+00> : vector<8x8xf32>
    %19 = tpu.matmul %17, %18, %cst_14 {dimension_numbers = #tpu.dot_dimension_numbers<[1], [0], [0], [1], [0, 0, 1, 1], [], []>} : vector<8x128xbf16>, vector<128x8xbf16>, vector<8x8xf32> -> vector<8x8xf32>
    %c0_15 = arith.constant 0 : index
    %c0_16 = arith.constant 0 : index
    %20 = vector.load %arg7[%c0_15, %c0_16] : memref<1x8xf32, #tpu.memory_space<vmem>>, vector<1x8xf32>
    %21 = vector.broadcast %20 : vector<1x8xf32> to vector<8x8xf32>
    %22 = arith.addf %19, %21 : vector<8x8xf32>
    %c0_17 = arith.constant 0 : index
    %c0_18 = arith.constant 0 : index
    %23 = vector.load %arg8[%c0_17, %c0_18] : memref<8x8xf32, #tpu.memory_space<vmem>>, vector<8x8xf32>
    tpu.vector_store %arg8[%c0_17, %c0_18], %22 {strides = array<i32>} : memref<8x8xf32, #tpu.memory_space<vmem>>, vector<8x8xf32>,
    return
  }
  func.func @transform_0(%arg0: i32) -> (i32, i32) {
    %c0_i32 = arith.constant 0 : i32
    %c0_i32_0 = arith.constant 0 : i32
    return %arg0, %c0_i32 : i32, i32
  }
  func.func @transform_1(%arg0: i32) -> (i32, i32) {
    %c0_i32 = arith.constant 0 : i32
    %c0_i32_0 = arith.constant 0 : i32
    %c0_i32_1 = arith.constant 0 : i32
    return %c0_i32, %c0_i32_0 : i32, i32
  }
  func.func @transform_2(%arg0: i32) -> (i32, i32) {
    %c0_i32 = arith.constant 0 : i32
    %c0_i32_0 = arith.constant 0 : i32
    %c0_i32_1 = arith.constant 0 : i32
    return %c0_i32, %c0_i32_0 : i32, i32
  }
  func.func @transform_3(%arg0: i32) -> (i32, i32) {
    %c0_i32 = arith.constant 0 : i32
    %c0_i32_0 = arith.constant 0 : i32
    %c0_i32_1 = arith.constant 0 : i32
    return %c0_i32, %c0_i32_0 : i32, i32
  }
  func.func @transform_4(%arg0: i32) -> (i32, i32) {
    %c0_i32 = arith.constant 0 : i32
    %c0_i32_0 = arith.constant 0 : i32
    %c0_i32_1 = arith.constant 0 : i32
    return %c0_i32, %c0_i32_0 : i32, i32
  }
  func.func @transform_5(%arg0: i32) -> (i32, i32) {
    %c0_i32 = arith.constant 0 : i32
    %c0_i32_0 = arith.constant 0 : i32
    %c0_i32_1 = arith.constant 0 : i32
    return %c0_i32, %c0_i32_0 : i32, i32
  }
  func.func @transform_6(%arg0: i32) -> (i32, i32) {
    %c0_i32 = arith.constant 0 : i32
    %c0_i32_0 = arith.constant 0 : i32
    %c0_i32_1 = arith.constant 0 : i32
    return %c0_i32, %c0_i32_0 : i32, i32
  }
  func.func @transform_7(%arg0: i32) -> (i32, i32) {
    %c0_i32 = arith.constant 0 : i32
    %c0_i32_0 = arith.constant 0 : i32
    return %arg0, %c0_i32 : i32, i32
  }
}

</mosaic_0001>

<bundles_post_ra>
// kernel: mlp_forward.1
= control target key start
LH: loop header
LB: loop body
LE: loop exit
PB: predicated region body
PF: predicated region fallthrough
CT: control target
= control target key end

     0   :  { %v426_v0 = vmov 0.0   ;;  %vm427_vm0 = vmmov 0   ;;  %vm44_vm1 = vcmask 130048   ;;  %vm314_vm2 = vcmask 64512   ;;  %s554_s1 = inlined_call_operand.vmem [shape: bf16[16,128], index: 1, kind: input, shape index: {}]   ;;  %s555_s0 = inlined_call_operand.vmem [shape: f32[8,16], index: 0, kind: input, shape index: {}]   ;;  %s556_s3 = inlined_call_operand.vmem [shape: bf16[128,128], index: 3, kind: input, shape index: {}]   ;;  %s557_s5 = inlined_call_operand.vmem [shape: bf16[128,8], index: 5, kind: input, shape index: {}]   ;;  %s558_s2 = inlined_call_operand.vmem [shape: f32[1,128], index: 2, kind: input, shape index: {}]   ;;  %s559_s4 = inlined_call_operand.vmem [shape: f32[1,128], index: 4, kind: input, shape index: {}]   ;;  %s560_s6 = inlined_call_operand.vmem [shape: f32[1,8], index: 6, kind: input, shape index: {}]   ;;  %s561_s7 = inlined_call_operand.vmem [shape: f32[8,8], index: 7, kind: output, shape index: {}]  }
   0x1   :  { %361 = vmatprep.subr.bf16.mxu0 %v426_v0  ;;  %v409_v1 = vld [vmem:[%s554_s1] sm:$0xff]   ;;  %363 = vmatprep.mubr.msk.bf16.mxu0 %vm427_vm0, %v426_v0  ;;  %v411_v5 = vld [vmem:[%s556_s3 + $0x8] sm:$0xff]   ;;  %v412_v6 = vld [vmem:[%s556_s3 + $0x10] sm:$0xff]  }
   0x2   :  { %v27_v2 = vld [vmem:[%s555_s0] sm:$0xff]  ;;  %367 = vmatprep.subr.bf16.mxu1 %v426_v0  ;;  %383 = vmatprep.mubr.msk.bf16.mxu1 %vm427_vm0, %v426_v0  ;;  %v413_v7 = vld [vmem:[%s556_s3 + $0x18] sm:$0xff]   ;;  %v415_v9 = vld [vmem:[%s556_s3 + $0x28] sm:$0xff]  }
   0x3   :  { %362 = vmatpush3.bf16.msra.mxu0 %v409_v1  ;;  %v28_v3 = vpack.c.bf16 %v27_v2, %v27_v2  ;;  %v410_v4 = vld [vmem:[%s556_s3] sm:$0xff]   ;;  %v416_v10 = vld [vmem:[%s556_s3 + $0x30] sm:$0xff]   ;;  %v417_v11 = vld [vmem:[%s556_s3 + $0x38] sm:$0xff]  }
   0x4   :  { %387 = vmatprep.subr.bf16.mxu0 %v426_v0  ;;  %368 = vmatpush3.bf16.msra.mxu1 %v410_v4  ;;  %v414_v8 = vld [vmem:[%s556_s3 + $0x20] sm:$0xff]   ;;  %v419_v13 = vld [vmem:[%s557_s5 + $0x8] sm:$0xff]   ;;  %v420_v14 = vld [vmem:[%s557_s5 + $0x10] sm:$0xff]  }
   0x5   :  { %369 = vmatprep.subr.bf16.mxu1 %v426_v0  ;;  %v418_v12 = vld [vmem:[%s557_s5] sm:$0xff]   ;;  %v421_v15 = vld [vmem:[%s557_s5 + $0x18] sm:$0xff]   ;;  %v423_v17 = vld [vmem:[%s557_s5 + $0x28] sm:$0xff]  }
   0x6   :  { %364 = vmatmul.mubr.msk.bf16.vlgmr.msra.gmra.mrb[0].mxu0 %vm44_vm1, %v28_v3  ;;  %v422_v16 = vld [vmem:[%s557_s5 + $0x20] sm:$0xff]   ;;  %v424_v26 = vld [vmem:[%s557_s5 + $0x30] sm:$0xff]   ;;  %v425_v27 = vld [vmem:[%s557_s5 + $0x38] sm:$0xff]  }
   0x7   :  { %403 = vmatprep.mubr.msk.bf16.mxu0 %vm427_vm0, %v426_v0  ;;  %388 = vmatpush3.bf16.msra.mxu0 %v418_v12  ;;  %v320_v18 = vld [vmem:[%s558_s2] ss:$0 sm:$0xff] }
   0x8   :  { %370 = vmatpush3.bf16.msra.mxu1 %v411_v5  ;;  %389 = vmatprep.subr.bf16.mxu0 %v426_v0  ;;  %v323_v28 = vld [vmem:[%s559_s4] ss:$0 sm:$0xff] }
   0x9   :  { %371 = vmatprep.subr.bf16.mxu1 %v426_v0  ;;  %v332_v36 = vld [vmem:[%s560_s6] ss:$0 sm:$0xff] }
   0xb   :  { %390 = vmatpush3.bf16.msra.mxu0 %v419_v13 }
   0xc   :  { %372 = vmatpush3.bf16.msra.mxu1 %v412_v6  ;;  %391 = vmatprep.subr.bf16.mxu0 %v426_v0 }
   0xd   :  { %373 = vmatprep.subr.bf16.mxu1 %v426_v0 }
   0xf   :  { %392 = vmatpush3.bf16.msra.mxu0 %v420_v14 }
  0x10   :  { %374 = vmatpush3.bf16.msra.mxu1 %v413_v7  ;;  %393 = vmatprep.subr.bf16.mxu0 %v426_v0 }
  0x11   :  { %375 = vmatprep.subr.bf16.mxu1 %v426_v0 }
  0x13   :  { %394 = vmatpush3.bf16.msra.mxu0 %v421_v15 }
  0x14   :  { %376 = vmatpush3.bf16.msra.mxu1 %v414_v8  ;;  %395 = vmatprep.subr.bf16.mxu0 %v426_v0 }
  0x15   :  { %377 = vmatprep.subr.bf16.mxu1 %v426_v0 }
  0x17   :  { %396 = vmatpush3.bf16.msra.mxu0 %v422_v16 }
  0x18   :  { %378 = vmatpush3.bf16.msra.mxu1 %v415_v9  ;;  %397 = vmatprep.subr.bf16.mxu0 %v426_v0 }
  0x19   :  { %379 = vmatprep.subr.bf16.mxu1 %v426_v0 }
  0x1b   :  { %398 = vmatpush3.bf16.msra.mxu0 %v423_v17 }
  0x1c   :  { %380 = vmatpush3.bf16.msra.mxu1 %v416_v10  ;;  %399 = vmatprep.subr.bf16.mxu0 %v426_v0 }
  0x1d   :  { %381 = vmatprep.subr.bf16.mxu1 %v426_v0 }
  0x1f   :  { %400 = vmatpush3.bf16.msra.mxu0 %v424_v26 }
  0x20   :  { %382 = vmatpush3.bf16.msra.mxu1 %v417_v11  ;;  %401 = vmatprep.subr.bf16.mxu0 %v426_v0 }
  0x23   :  { %402 = vmatpush3.bf16.msra.mxu0 %v425_v27 }
  0xd9   :  { %v82_v19 = vpop.f32.mrb[0].mxu0 }
  0xda   :  { %v83_v20 = vadd.f32 %v320_v18, %v82_v19  ;;  %v365_v21 = vpop.f32.mrb[1].mxu0 }
  0xdb   :  { %v85_v22 = vpop.f32.mrb[2].mxu0 }
  0xdc   :  { %v88_v23 = vmax.f32 %v83_v20, 0.0  ;;  %v366_v24 = vpop.f32.mrb[3].mxu0 }
  0xde   :  { %v89_v25 = vpack.c.bf16 %v88_v23, %v88_v23 }
  0xe0   :  { %384 = vmatmul.mubr.bf16.vlgmr.msra.gmra.mrb[0].mxu1 %v89_v25 }
 0x1b3   :  { %v195_v29 = vpop.f32.mrb[0].mxu1 }
 0x1b4   :  { %v196_v30 = vadd.f32 %v323_v28, %v195_v29  ;;  %v385_v31 = vpop.f32.mrb[1].mxu1 }
 0x1b5   :  { %v198_v32 = vpop.f32.mrb[2].mxu1 }
 0x1b6   :  { %v201_v33 = vmax.f32 %v196_v30, 0.0  ;;  %v386_v34 = vpop.f32.mrb[3].mxu1 }
 0x1b8   :  { %v202_v35 = vpack.c.bf16 %v201_v33, %v201_v33 }
 0x1ba   :  { %404 = vmatmul.mubr.bf16.vlgmr.msra.gmra.mrb[4].mxu0 %v202_v35 }
 0x28d   :  { %v308_v37 = vpop.f32.mrb[4].mxu0 }
 0x28e   :  { %v309_v38 = vadd.f32 %v332_v36, %v308_v37  ;;  %v405_v39 = vpop.f32.mrb[5].mxu0 }
 0x28f   :  { %v311_v40 = vpop.f32.mrb[6].mxu0 }
 0x290   :  { %315 = vst.msk [vmem:[%s561_s7] sm:$0xff] %vm314_vm2, %v309_v38  ;;  %v406_v41 = vpop.f32.mrb[7].mxu0 }

</bundles_post_ra>
